<compile_context>
chip_gen: v7x
topology: tpu7x:2x2x1
jax: 0.10.0
libtpu: 0.0.40
codegen_flags: <defaults>
</compile_context>

<pallas_src>
import functools

import jax
import jax.numpy as jnp
from jax.experimental import pallas as pl
from jax.experimental.pallas import tpu as pltpu

B, CIN, H, W = 2, 4, 16, 16
COUT, NCLS = 16, 8
KH = KW = 3
NCOPIES = 4

CKK = CIN * KH * KW          # 36
HW = H * W                   # 256
BHW = B * HW                 # 512


def _augerino_kernel(n, gb_ref, patT_ref, hmask_ref, pslab_ref, out_ref):
    """Single invocation (no grid); everything fits easily in VMEM.

    gb_ref    : SMEM (2n,)  per-copy scalars  [g_0..g_{n-1}, b_0..b_{n-1}]
    patT_ref  : VMEM (CKK, BHW) bf16   im2col(x), lane-dense
    hmask_ref : VMEM (COUT, BHW) f32   conv_w @ im2col(ones)  (precomputed)
    pslab_ref : VMEM (COUT+NCLS, 128) f32 packed params
    out_ref   : VMEM (NCLS, B) f32
    """
    # --- one-time, copy-invariant conv matmul (bf16 operands, f32 accumulate) ---
    wconv = pslab_ref[0:COUT, 0:CKK].astype(jnp.bfloat16)          # (COUT, CKK)
    hconv = jnp.dot(wconv, patT_ref[...],
                    preferred_element_type=jnp.float32)            # (COUT, BHW)
    hmask = hmask_ref[...]                                         # (COUT, BHW)

    # hoisted broadcast of the conv bias (JAX does not CSE broadcast_in_dim)
    bconv_full = jnp.broadcast_to(pslab_ref[0:COUT, CKK:CKK + 1],
                                  (COUT, BHW))                     # (COUT, BHW)

    # --- per-copy path: purely elementwise (VPU), statically unrolled ---
    acc = jnp.zeros_like(hconv)
    for i in range(n):
        g = gb_ref[i]          # scalar from SMEM
        b = gb_ref[n + i]      # scalar from SMEM
        acc = acc + jnp.maximum(g * hconv + b * hmask + bconv_full, 0.0)

    # --- mean over copies + global average pool: lane (XLU) reduction over
    #     lane-aligned 256-wide slices; scale 1/(n*HW) folded in ---
    inv = 1.0 / (n * HW)
    cols = [jnp.sum(acc[:, bi * HW:(bi + 1) * HW], axis=1, keepdims=True) * inv
            for bi in range(B)]
    pooled = jnp.concatenate(cols, axis=1)                         # (COUT, B)

    # --- classifier head (kept as (NCLS, B); transposed in the wrapper) ---
    wfc = pslab_ref[COUT:COUT + NCLS, 0:COUT]                      # (NCLS, COUT)
    bfc = pslab_ref[COUT:COUT + NCLS, COUT:COUT + 1]               # (NCLS, 1)
    out_ref[...] = (jnp.dot(wfc, pooled,
                            preferred_element_type=jnp.float32) + bfc)


def _im2col_t(x):
    """x: (B, C, H, W) -> (C*KH*KW, B*H*W); rows (c, kh, kw), cols (b, h, w)."""
    xp = jnp.pad(x, ((0, 0), (0, 0), (1, 1), (1, 1)))
    cols = []
    for kh in range(KH):
        for kw in range(KW):
            cols.append(xp[:, :, kh:kh + H, kw:kw + W])            # (B, C, H, W)
    p = jnp.stack(cols, axis=2)                                    # (B, C, KK, H, W)
    p = p.transpose(1, 2, 0, 3, 4)                                 # (C, KK, B, H, W)
    return p.reshape(CKK, BHW)


# x-independent border-indicator im2col: a module-level constant, so it is
# baked into the jitted graph instead of being rebuilt every call.
_MASKT = _im2col_t(jnp.ones((B, CIN, H, W), jnp.float32))          # (CKK, BHW)


@functools.partial(jax.jit, static_argnames=("training",))
def augerino_forward(x, params, eps, training=False):
    """eps: (n, 2) ~ U(-1, 1); n = 1 when training, ncopies when eval."""
    del training  # shape of `eps` already encodes train (n=1) vs eval (n=ncopies)
    n = eps.shape[0]

    # per-copy affine-aug scalars
    sw = jax.nn.softplus(params["aug_scale_width"])
    bw = jax.nn.softplus(params["aug_shift_width"])
    g = 1.0 + eps[:, 0] * sw
    b = eps[:, 1] * bw
    gb = jnp.concatenate([g, b]).astype(jnp.float32)               # (2n,) -> SMEM

    # data-dependent im2col (lane-dense, bf16 operand for the MXU)
    patT = _im2col_t(x).astype(jnp.bfloat16)                       # (CKK, BHW)

    wconv = params["conv_w"].reshape(COUT, CKK).astype(jnp.float32)
    # hmask depends only on conv_w (maskT is a constant) -> compute once outside
    hmask = jnp.dot(wconv, _MASKT,
                    preferred_element_type=jnp.float32)            # (COUT, BHW)

    # pack the tiny parameter tensors into one (24, 128) f32 VMEM slab
    pslab = jnp.zeros((COUT + NCLS, 128), jnp.float32)
    pslab = pslab.at[0:COUT, 0:CKK].set(wconv)
    pslab = pslab.at[0:COUT, CKK].set(params["conv_b"].astype(jnp.float32))
    pslab = pslab.at[COUT:COUT + NCLS, 0:COUT].set(
        params["fc_w"].astype(jnp.float32))
    pslab = pslab.at[COUT:COUT + NCLS, COUT].set(
        params["fc_b"].astype(jnp.float32))

    kernel = functools.partial(_augerino_kernel, n)
    vmem = pl.BlockSpec(memory_space=pltpu.MemorySpace.VMEM)

    out_t = pl.pallas_call(
        kernel,
        out_shape=jax.ShapeDtypeStruct((NCLS, B), jnp.float32),
        in_specs=[
            pl.BlockSpec(memory_space=pltpu.MemorySpace.SMEM),     # gb scalars
            vmem,                                                  # patT (bf16)
            vmem,                                                  # hmask
            vmem,                                                  # packed params
        ],
        out_specs=pl.BlockSpec(memory_space=pltpu.MemorySpace.VMEM),
    )(gb, patT, hmask, pslab)

    return out_t.T                                                 # (B, NCLS)


def reference_forward(x, params, eps):
    """Pure-JAX reference (mirrors the PyTorch module)."""
    sw = jax.nn.softplus(params["aug_scale_width"])
    bw = jax.nn.softplus(params["aug_shift_width"])
    outs = []
    for i in range(eps.shape[0]):
        xa = x * (1.0 + eps[i, 0] * sw) + eps[i, 1] * bw
        y = jax.lax.conv_general_dilated(
            xa, params["conv_w"], window_strides=(1, 1),
            padding=((1, 1), (1, 1)),
            dimension_numbers=("NCHW", "OIHW", "NCHW"))
        y = y + params["conv_b"][None, :, None, None]
        y = jnp.maximum(y, 0.0)
        pooled = y.mean(axis=(2, 3))
        outs.append(pooled @ params["fc_w"].T + params["fc_b"])
    return jnp.stack(outs).mean(axis=0)


if __name__ == "__main__":
    key = jax.random.PRNGKey(0)
    kx, kc, kcb, kf, kfb, ke = jax.random.split(key, 6)

    x = jax.random.normal(kx, (B, CIN, H, W), jnp.float32)
    params = {
        "conv_w": 0.1 * jax.random.normal(kc, (COUT, CIN, KH, KW), jnp.float32),
        "conv_b": 0.05 * jax.random.normal(kcb, (COUT,), jnp.float32),
        "fc_w": 0.1 * jax.random.normal(kf, (NCLS, COUT), jnp.float32),
        "fc_b": 0.05 * jax.random.normal(kfb, (NCLS,), jnp.float32),
        "aug_scale_width": jnp.float32(-1.0),
        "aug_shift_width": jnp.float32(-1.0),
    }
    # fresh augmentation samples per copy (eval mode -> NCOPIES copies)
    eps = jax.random.uniform(ke, (NCOPIES, 2), jnp.float32, -1.0, 1.0)

    out = augerino_forward(x, params, eps, training=False)
    out = jax.block_until_ready(out)

    ref = reference_forward(x, params, eps)
    assert out.shape == (B, NCLS), out.shape
    assert bool(jnp.allclose(out, ref, rtol=1e-2, atol=1e-2)), (out, ref)

    print("KERNEL_OK")
</pallas_src>

<mosaic_0001>
module attributes {stable_mosaic.version = 11 : i64} {
  func.func @_augerino_kernel(%arg0: memref<8xf32, #tpu.memory_space<smem>>, %arg1: memref<36x512xbf16, #tpu.memory_space<vmem>>, %arg2: memref<16x512xf32, #tpu.memory_space<vmem>>, %arg3: memref<24x128xf32, #tpu.memory_space<vmem>>, %arg4: memref<8x2xf32, #tpu.memory_space<vmem>>) attributes {dimension_semantics = [], scalar_prefetch = 0 : i64, scratch_operands = 0 : i64, tpu.core_type = #tpu.core_type<tc>} {
    %c0 = arith.constant 0 : index
    %c0_0 = arith.constant 0 : index
    %0 = vector.load %arg3[%c0, %c0_0] : memref<24x128xf32, #tpu.memory_space<vmem>>, vector<16x36xf32>
    %1 = arith.truncf %0 : vector<16x36xf32> to vector<16x36xbf16>
    %c0_1 = arith.constant 0 : index
    %c0_2 = arith.constant 0 : index
    %2 = vector.load %arg1[%c0_1, %c0_2] : memref<36x512xbf16, #tpu.memory_space<vmem>>, vector<36x512xbf16>
    %cst = arith.constant dense<0.000000e+00> : vector<16x512xf32>
    %3 = tpu.matmul %1, %2, %cst {dimension_numbers = #tpu.dot_dimension_numbers<[1], [0], [0], [1], [0, 0, 1, 1], [], []>} : vector<16x36xbf16>, vector<36x512xbf16>, vector<16x512xf32> -> vector<16x512xf32>
    %c0_3 = arith.constant 0 : index
    %c0_4 = arith.constant 0 : index
    %4 = vector.load %arg2[%c0_3, %c0_4] : memref<16x512xf32, #tpu.memory_space<vmem>>, vector<16x512xf32>
    %c0_5 = arith.constant 0 : index
    %c36 = arith.constant 36 : index
    %5 = vector.load %arg3[%c0_5, %c36] : memref<24x128xf32, #tpu.memory_space<vmem>>, vector<16x1xf32>
    %6 = vector.shape_cast %5 : vector<16x1xf32> to vector<16x1xf32>
    %7 = vector.broadcast %6 : vector<16x1xf32> to vector<16x512xf32>
    %cst_6 = arith.constant 0.000000e+00 : f32
    %8 = vector.broadcast %cst_6 : f32 to vector<16x512xf32>
    %c0_7 = arith.constant 0 : index
    %9 = memref.load %arg0[%c0_7] : memref<8xf32, #tpu.memory_space<smem>>
    %c4 = arith.constant 4 : index
    %10 = memref.load %arg0[%c4] : memref<8xf32, #tpu.memory_space<smem>>
    %11 = vector.broadcast %9 : f32 to vector<16x512xf32>
    %12 = arith.mulf %11, %3 : vector<16x512xf32>
    %13 = vector.broadcast %10 : f32 to vector<16x512xf32>
    %14 = arith.mulf %13, %4 : vector<16x512xf32>
    %15 = arith.addf %12, %14 : vector<16x512xf32>
    %16 = arith.addf %15, %7 : vector<16x512xf32>
    %cst_8 = arith.constant 0.000000e+00 : f32
    %17 = vector.broadcast %cst_8 : f32 to vector<16x512xf32>
    %18 = arith.maximumf %16, %17 : vector<16x512xf32>
    %19 = arith.addf %8, %18 : vector<16x512xf32>
    %c1 = arith.constant 1 : index
    %20 = memref.load %arg0[%c1] : memref<8xf32, #tpu.memory_space<smem>>
    %c5 = arith.constant 5 : index
    %21 = memref.load %arg0[%c5] : memref<8xf32, #tpu.memory_space<smem>>
    %22 = vector.broadcast %20 : f32 to vector<16x512xf32>
    %23 = arith.mulf %22, %3 : vector<16x512xf32>
    %24 = vector.broadcast %21 : f32 to vector<16x512xf32>
    %25 = arith.mulf %24, %4 : vector<16x512xf32>
    %26 = arith.addf %23, %25 : vector<16x512xf32>
    %27 = arith.addf %26, %7 : vector<16x512xf32>
    %cst_9 = arith.constant 0.000000e+00 : f32
    %28 = vector.broadcast %cst_9 : f32 to vector<16x512xf32>
    %29 = arith.maximumf %27, %28 : vector<16x512xf32>
    %30 = arith.addf %19, %29 : vector<16x512xf32>
    %c2 = arith.constant 2 : index
    %31 = memref.load %arg0[%c2] : memref<8xf32, #tpu.memory_space<smem>>
    %c6 = arith.constant 6 : index
    %32 = memref.load %arg0[%c6] : memref<8xf32, #tpu.memory_space<smem>>
    %33 = vector.broadcast %31 : f32 to vector<16x512xf32>
    %34 = arith.mulf %33, %3 : vector<16x512xf32>
    %35 = vector.broadcast %32 : f32 to vector<16x512xf32>
    %36 = arith.mulf %35, %4 : vector<16x512xf32>
    %37 = arith.addf %34, %36 : vector<16x512xf32>
    %38 = arith.addf %37, %7 : vector<16x512xf32>
    %cst_10 = arith.constant 0.000000e+00 : f32
    %39 = vector.broadcast %cst_10 : f32 to vector<16x512xf32>
    %40 = arith.maximumf %38, %39 : vector<16x512xf32>
    %41 = arith.addf %30, %40 : vector<16x512xf32>
    %c3 = arith.constant 3 : index
    %42 = memref.load %arg0[%c3] : memref<8xf32, #tpu.memory_space<smem>>
    %c7 = arith.constant 7 : index
    %43 = memref.load %arg0[%c7] : memref<8xf32, #tpu.memory_space<smem>>
    %44 = vector.broadcast %42 : f32 to vector<16x512xf32>
    %45 = arith.mulf %44, %3 : vector<16x512xf32>
    %46 = vector.broadcast %43 : f32 to vector<16x512xf32>
    %47 = arith.mulf %46, %4 : vector<16x512xf32>
    %48 = arith.addf %45, %47 : vector<16x512xf32>
    %49 = arith.addf %48, %7 : vector<16x512xf32>
    %cst_11 = arith.constant 0.000000e+00 : f32
    %50 = vector.broadcast %cst_11 : f32 to vector<16x512xf32>
    %51 = arith.maximumf %49, %50 : vector<16x512xf32>
    %52 = arith.addf %41, %51 : vector<16x512xf32>
    %53 = vector.extract_strided_slice %52 {offsets = [0, 0], sizes = [16, 256], strides = [1, 1]} : vector<16x512xf32> to vector<16x256xf32>
    %cst_12 = arith.constant dense<0.000000e+00> : vector<16xf32>
    %54 = vector.multi_reduction <add>, %53, %cst_12 [1] : vector<16x256xf32> to vector<16xf32>
    %55 = vector.shape_cast %54 : vector<16xf32> to vector<16x1xf32>
    %cst_13 = arith.constant 9.765625E-4 : f32
    %56 = vector.broadcast %cst_13 : f32 to vector<16x1xf32>
    %57 = arith.mulf %55, %56 : vector<16x1xf32>
    %58 = vector.extract_strided_slice %52 {offsets = [0, 256], sizes = [16, 256], strides = [1, 1]} : vector<16x512xf32> to vector<16x256xf32>
    %cst_14 = arith.constant dense<0.000000e+00> : vector<16xf32>
    %59 = vector.multi_reduction <add>, %58, %cst_14 [1] : vector<16x256xf32> to vector<16xf32>
    %60 = vector.shape_cast %59 : vector<16xf32> to vector<16x1xf32>
    %cst_15 = arith.constant 9.765625E-4 : f32
    %61 = vector.broadcast %cst_15 : f32 to vector<16x1xf32>
    %62 = arith.mulf %60, %61 : vector<16x1xf32>
    %63 = tpu.concatenate %57, %62 in 1 : vector<16x1xf32>, vector<16x1xf32> -> vector<16x2xf32>
    %c16 = arith.constant 16 : index
    %c0_16 = arith.constant 0 : index
    %64 = vector.load %arg3[%c16, %c0_16] : memref<24x128xf32, #tpu.memory_space<vmem>>, vector<8x16xf32>
    %c16_17 = arith.constant 16 : index
    %c16_18 = arith.constant 16 : index
    %65 = vector.load %arg3[%c16_17, %c16_18] : memref<24x128xf32, #tpu.memory_space<vmem>>, vector<8x1xf32>
    %cst_19 = arith.constant dense<0.000000e+00> : vector<8x2xf32>
    %66 = tpu.matmul %64, %63, %cst_19 {dimension_numbers = #tpu.dot_dimension_numbers<[1], [0], [0], [1], [0, 0, 1, 1], [], []>} : vector<8x16xf32>, vector<16x2xf32>, vector<8x2xf32> -> vector<8x2xf32>
    %67 = vector.broadcast %65 : vector<8x1xf32> to vector<8x2xf32>
    %68 = arith.addf %66, %67 : vector<8x2xf32>
    %c0_20 = arith.constant 0 : index
    %c0_21 = arith.constant 0 : index
    %69 = vector.load %arg4[%c0_20, %c0_21] : memref<8x2xf32, #tpu.memory_space<vmem>>, vector<8x2xf32>
    tpu.vector_store %arg4[%c0_20, %c0_21], %68 {strides = array<i32>} : memref<8x2xf32, #tpu.memory_space<vmem>>, vector<8x2xf32>,
    return
  }
}

</mosaic_0001>

<bundles_post_ra>
// kernel: augerino_forward.1
= control target key start
LH: loop header
LB: loop body
LE: loop exit
PB: predicated region body
PF: predicated region fallthrough
CT: control target
= control target key end

     0   :  { %9 = vsyncpa [#allocation3], 0  ;;  %s879_s0 = inlined_call_operand.vmem [shape: f32[8], index: 0, kind: input, shape index: {}]   ;;  %s880_s1 = inlined_call_operand.vmem [shape: bf16[36,512], index: 1, kind: input, shape index: {}]   ;;  %s881_s2 = inlined_call_operand.vmem [shape: f32[16,512], index: 2, kind: input, shape index: {}]   ;;  %s882_s3 = inlined_call_operand.vmem [shape: f32[24,128], index: 3, kind: input, shape index: {}]   ;;  %s883_s4 = inlined_call_operand.vmem [shape: f32[8,2], index: 4, kind: output, shape index: {}]  }
   0x1   :  { %s16_s17 = sshll.u32 %s879_s0, 4  ;;  %s17_s17 = int_to_ptr.vmem [resolvable:$true] %s16_s17 }
   0x2   :  { %s591_s18 = scalar_lea.vmem %s17_s17, 16  ;;  %p596_p1 = scmp.lt.s32.totalorder %s17_s17, %s17_s17 }
   0x3   :  { %p592_p0 = scmp.ne.s32.totalorder %s17_s17, %s591_s18  ;;  %p597_p2 = scmp.lt.s32.totalorder %s591_s18, %s591_s18 }
   0x5   :  { %p598_p3 = por %p597_p2, %p596_p1 }
   0x7   :  { %p599_p4 = pnand %p598_p3, %p592_p0 }
   0x9   :  { %602 = shalt.err (!%p599_p4)
}
   0xa   :  { %s605_s19 = smov [#allocation2]  }
   0xb   :  { %19 = dma.vmem_to_smem %s17_s17, 16, %s605_s19, [#allocation3]  }
   0xc   :  { %603 = dma.done.wait [#allocation3], 16  }
   0xd   :  { %604 = vsyncadd [#allocation3], 4294967280 }
   0xe   :  { %29 = sfence }
   0xf   :  { %v575_v0 = vld [vmem:[%s880_s1 + $0x4] ss:$16 sps:$4 sm:$0xff]   ;;  %v577_v1 = vld [vmem:[%s880_s1 + $0xc] ss:$16 sps:$4 sm:$0xff]   ;;  %v606_v2 = vmov 0   ;;  %v607_v5 = vmov 36  }
  0x10   :  { %143 = vmatprep.mubr.bf16.mxu0 %v606_v2  ;;  %186 = vmatprep.mubr.bf16.mxu1 %v606_v2  ;;  %v579_v3 = vld [vmem:[%s880_s1] ss:$16 sps:$4 sm:$0xff]   ;;  %v580_v4 = vld [vmem:[%s880_s1 + $0x8] ss:$16 sps:$4 sm:$0xff]   ;;  %v581_v6 = vld [vmem:[%s880_s1 + $0x24] ss:$16 sps:$4 sm:$0xff]  }
  0x11   :  { %111 = vmatprep.subr.bf16.mxu0 %v575_v0  ;;  %572 = vset.pattern.permute.xlu0 %v607_v5  ;;  %v583_v7 = vld [vmem:[%s880_s1 + $0x2c] ss:$16 sps:$4 sm:$0xff]   ;;  %v585_v8 = vld [vmem:[%s880_s1 + $0x20] ss:$16 sps:$4 sm:$0xff]   ;;  %vm98_vm0 = vcmask 1041408   ;;  %vm94_vm1 = vcmask 293888  }
  0x12   :  { %154 = vmatprep.subr.bf16.mxu1 %v577_v1  ;;  %112 = vmatpush1.bf16.msra.mxu0 %v579_v3  ;;  %v586_v9 = vld [vmem:[%s880_s1 + $0x28] ss:$16 sps:$4 sm:$0xff]   ;;  %v42_v10 = vld [vmem:[%s880_s1 + $0x40] sm:$0x33]  ;;  %s546_s17 = sld [smem:[#allocation2 + $0x5]]  ;;  %s548_s18 = sld [smem:[#allocation2 + $0x6]] }
  0x13   :  { %155 = vmatpush1.bf16.msra.mxu1 %v580_v4  ;;  %113 = vmatprep.subr.bf16.mxu0 %v581_v6  ;;  %v43_v11 = vld [vmem:[%s880_s1 + $0x48] sm:$0x33]  ;;  %v537_v12 = vcombine.high %v42_v10, %v42_v10  ;;  %v536_v14 = vcombine.low %v42_v10, %v42_v10  ;;  %v31_v16 = vld [vmem:[%s882_s3] sm:$0xff]  ;;  %s544_s1 = sld [smem:[#allocation2 + $0x4]]  ;;  %s215_s19 = sld [smem:[#allocation2]]  ;;  %v199_v25 = vld [vmem:[%s881_s2 + $0x10] sm:$0xff] }
  0x14   :  { %156 = vmatprep.subr.bf16.mxu1 %v583_v7  ;;  %v539_v13 = vcombine.high %v43_v11, %v43_v11  ;;  %v538_v15 = vcombine.low %v43_v11, %v43_v11  ;;  %207 = vperm.xlu0 %572, %v31_v16   ;;  %v32_v17 = vld [vmem:[%s882_s3 + $0x8] sm:$0xff]  ;;  %s545_s20 = sld [smem:[#allocation2 + $0x1]]  ;;  %s550_s21 = sld [smem:[#allocation2 + $0x7]]  ;;  %v197_v21 = vld [vmem:[%s881_s2] sm:$0xff]  ;;  %v200_v31 = vld [vmem:[%s881_s2 + $0x18] sm:$0xff]  ;;  %vm609_vm2 = vmmov 0  }
  0x15   :  { %v100_v18 = vsel %vm98_vm0, %v536_v14, 0  ;;  %v33_v20 = vpack.c.bf16 %v32_v17, %v31_v16  ;;  %s547_s22 = sld [smem:[#allocation2 + $0x2]]  ;;  %s549_s23 = sld [smem:[#allocation2 + $0x3]]  ;;  %v198_v26 = vld [vmem:[%s881_s2 + $0x8] sm:$0xff]  ;;  %v201_v36 = vld [vmem:[%s881_s2 + $0x20] sm:$0xff]  ;;  %v203_v41 = vld [vmem:[%s881_s2 + $0x30] sm:$0xff] }
  0x16   :  { %114 = vmatpush1.bf16.msra.mxu0 %v585_v8  ;;  %v106_v19 = vsel %vm98_vm0, %v538_v15, 0  ;;  %v202_v46 = vld [vmem:[%s881_s2 + $0x28] sm:$0xff]  ;;  %v204_v51 = vld [vmem:[%s881_s2 + $0x38] sm:$0xff]  ;;  %vm439_vm3 = vcmask 7168   ;;  %vm448_vm4 = vcmask 130048   ;;  %vm521_vm5 = vcmask 15360  }
  0x17   :  { %157 = vmatpush1.bf16.msra.mxu1 %v586_v9  ;;  %540 = vmatprep.subr.msk.bf16.mxu0 %vm98_vm0, %v537_v12 }
  0x18   :  { %542 = vmatprep.subr.msk.bf16.mxu1 %vm98_vm0, %v539_v13  ;;  %212 = vperm.xlu0 %572, %v32_v17   ;;  %v278_v23 = vstv %s546_s17  ;;  %v330_v24 = vstv %s548_s18 }
  0x19   :  { %v226_v22 = vstv %s544_s1  ;;  %v689_v27 = vstv %s215_s19  ;;  %v279_v32 = vmul.f32 %v278_v23, %v197_v21  ;;  %v331_v34 = vmul.f32 %v330_v24, %v197_v21 }
  0x1a   :  { %116 = vmatpush1.bf16.msra.mxu0 %v100_v18  ;;  %v227_v28 = vmul.f32 %v226_v22, %v197_v21  ;;  %v691_v29 = vstv %s545_s20  ;;  %v382_v30 = vstv %s550_s21  ;;  %v229_v35 = vmul.f32 %v226_v22, %v199_v25 }
  0x1b   :  { %159 = vmatpush1.bf16.msra.mxu1 %v106_v19  ;;  %v696_v33 = vstv %s547_s22  ;;  %v701_v37 = vstv %s549_s23  ;;  %v281_v38 = vmul.f32 %v278_v23, %v199_v25  ;;  %v333_v39 = vmul.f32 %v330_v24, %v199_v25 }
  0x1c   :  { %v228_v40 = vmul.f32 %v226_v22, %v198_v26  ;;  %v385_v42 = vmul.f32 %v382_v30, %v199_v25  ;;  %v280_v43 = vmul.f32 %v278_v23, %v198_v26  ;;  %v332_v44 = vmul.f32 %v330_v24, %v198_v26 }
  0x1d   :  { %541 = vmatmul.mubr.msk.bf16.vlgmr.msra.gmra.mrb[0].mxu0 %vm94_vm1, %v33_v20  ;;  %v230_v45 = vmul.f32 %v226_v22, %v200_v31  ;;  %v282_v47 = vmul.f32 %v278_v23, %v200_v31  ;;  %v334_v48 = vmul.f32 %v330_v24, %v200_v31  ;;  %v386_v49 = vmul.f32 %v382_v30, %v200_v31 }
  0x1e   :  { %543 = vmatmul.mubr.msk.bf16.vlgmr.msra.gmra.mrb[0].mxu1 %vm94_vm1, %v33_v20  ;;  %v231_v50 = vmul.f32 %v226_v22, %v201_v36  ;;  %v283_v52 = vmul.f32 %v278_v23, %v201_v36  ;;  %v712_v53 = vmul.f32 %v330_v24, %v201_v36  ;;  %v714_v54 = vmul.f32 %v382_v30, %v201_v36 }
  0x1f   :  { %v716_v55 = vmul.f32 %v226_v22, %v203_v41  ;;  %v718_v56 = vmul.f32 %v278_v23, %v203_v41  ;;  %v720_v57 = vmul.f32 %v330_v24, %v203_v41  ;;  %v722_v58 = vmul.f32 %v382_v30, %v203_v41 }
  0x20   :  { %v724_v59 = vmul.f32 %v226_v22, %v202_v46  ;;  %v726_v60 = vmul.f32 %v278_v23, %v202_v46  ;;  %v728_v61 = vmul.f32 %v330_v24, %v202_v46  ;;  %v730_v62 = vmul.f32 %v382_v30, %v202_v46 }
  0x21   :  { %v732_v63 = vmul.f32 %v226_v22, %v204_v51  ;;  %v734_v2 = vmul.f32 %v278_v23, %v204_v51  ;;  %v736_v3 = vmul.f32 %v330_v24, %v204_v51  ;;  %v738_v4 = vmul.f32 %v382_v30, %v204_v51 }
  0x22   :  { %v740_v5 = vmul.f32 %v382_v30, %v197_v21  ;;  %v745_v11 = vmul.f32 %v382_v30, %v198_v26 }
  0xf0   :  { %v145_v0 = vpop.f32.mrb[0].mxu0 }
  0xf1   :  { %v188_v1 = vpop.f32.mrb[0].mxu1  ;;  %v218_v6 = vmul.f32 %v689_v27, %v145_v0  ;;  %v270_v7 = vmul.f32 %v691_v29, %v145_v0  ;;  %v322_v8 = vmul.f32 %v696_v33, %v145_v0  ;;  %v147_v9 = vpop.f32.mrb[1].mxu0  ;;  %v756_v20 = vmul.f32 %v701_v37, %v145_v0 }
  0xf2   :  { %v190_v10 = vpop.f32.mrb[1].mxu1  ;;  %v220_v12 = vmul.f32 %v689_v27, %v188_v1  ;;  %v272_v13 = vmul.f32 %v691_v29, %v188_v1  ;;  %v324_v14 = vmul.f32 %v696_v33, %v188_v1  ;;  %v376_v15 = vmul.f32 %v701_v37, %v188_v1  ;;  %v149_v16 = vpop.f32.mrb[2].mxu0 }
  0xf3   :  { %v192_v17 = vpop.f32.mrb[2].mxu1  ;;  %v751_v18 = vadd.f32 %v227_v28, %v218_v6  ;;  %v753_v19 = vadd.f32 %v279_v32, %v270_v7  ;;  %v219_v21 = vmul.f32 %v689_v27, %v147_v9  ;;  %v151_v22 = vpop.f32.mrb[3].mxu0  ;;  %v759_v24 = vadd.f32 %v331_v34, %v322_v8 }
  0xf4   :  { %v194_v23 = vpop.f32.mrb[3].mxu1  ;;  %v237_v25 = vadd.f32 %v229_v35, %v220_v12  ;;  %v289_v26 = vadd.f32 %v281_v38, %v272_v13  ;;  %v341_v30 = vadd.f32 %v333_v39, %v324_v14  ;;  %v393_v31 = vadd.f32 %v385_v42, %v376_v15  ;;  %v778_v7 = vpop.permute.xlu0 %207 }
  0xf5   :  { %v761_v36 = vadd.f32 %v228_v40, %v219_v21  ;;  %v271_v28 = vmul.f32 %v691_v29, %v147_v9  ;;  %v323_v32 = vmul.f32 %v696_v33, %v147_v9  ;;  %v221_v41 = vmul.f32 %v689_v27, %v190_v10 }
  0xf6   :  { %v273_v46 = vmul.f32 %v691_v29, %v190_v10  ;;  %v325_v51 = vmul.f32 %v696_v33, %v190_v10  ;;  %v377_v0 = vmul.f32 %v701_v37, %v190_v10  ;;  %v772_v35 = vmul.f32 %v701_v37, %v147_v9 }
  0xf7   :  { %v769_v34 = vadd.f32 %v280_v43, %v271_v28  ;;  %v222_v38 = vmul.f32 %v689_v27, %v149_v16  ;;  %v274_v39 = vmul.f32 %v691_v29, %v149_v16  ;;  %v776_v40 = vadd.f32 %v332_v44, %v323_v32 }
  0xf8   :  { %v238_v42 = vadd.f32 %v230_v45, %v221_v41  ;;  %v290_v1 = vadd.f32 %v282_v47, %v273_v46  ;;  %v342_v6 = vadd.f32 %v334_v48, %v325_v51  ;;  %v394_v8 = vadd.f32 %v386_v49, %v377_v0 }
  0xf9   :  { %v780_v12 = vadd.f32 %v231_v50, %v222_v38  ;;  %v326_v43 = vmul.f32 %v696_v33, %v149_v16  ;;  %v378_v10 = vmul.f32 %v701_v37, %v149_v16  ;;  %v785_v13 = vadd.f32 %v283_v52, %v274_v39 }
  0xfa   :  { %v246_v9 = vadd.f32 %v238_v42, %v778_v7  ;;  %v224_v14 = vmul.f32 %v689_v27, %v192_v17  ;;  %v276_v44 = vmul.f32 %v691_v29, %v192_v17  ;;  %v298_v45 = vadd.f32 %v290_v1, %v778_v7 }
  0xfb   :  { %v791_v47 = vadd.f32 %v712_v53, %v326_v43  ;;  %v328_v48 = vmul.f32 %v696_v33, %v192_v17  ;;  %v380_v49 = vmul.f32 %v701_v37, %v192_v17  ;;  %v796_v50 = vadd.f32 %v714_v54, %v378_v10 }
  0xfc   :  { %v799_v15 = vadd.f32 %v716_v55, %v224_v14  ;;  %v223_v52 = vmul.f32 %v689_v27, %v151_v22  ;;  %v275_v16 = vmul.f32 %v691_v29, %v151_v22  ;;  %v804_v21 = vadd.f32 %v718_v56, %v276_v44 }
  0xfd   :  { %v807_v53 = vadd.f32 %v720_v57, %v328_v48  ;;  %v327_v28 = vmul.f32 %v696_v33, %v151_v22  ;;  %v379_v17 = vmul.f32 %v701_v37, %v151_v22  ;;  %v812_v54 = vadd.f32 %v722_v58, %v380_v49 }
  0xfe   :  { %v240_v55 = vadd.f32 %v724_v59, %v223_v52  ;;  %v225_v32 = vmul.f32 %v689_v27, %v194_v23  ;;  %v277_v41 = vmul.f32 %v691_v29, %v194_v23  ;;  %v292_v46 = vadd.f32 %v726_v60, %v275_v16 }
  0xff   :  { %v344_v56 = vadd.f32 %v728_v61, %v327_v28  ;;  %v820_v57 = vadd.f32 %v730_v62, %v379_v17  ;;  %v329_v51 = vmul.f32 %v696_v33, %v194_v23  ;;  %v827_v58 = vmul.f32 %v701_v37, %v194_v23 }
 0x100   :  { %v824_v22 = vadd.f32 %v732_v63, %v225_v32  ;;  %v245_v59 = vadd.f32 %v237_v25, %v778_v7  ;;  %v254_v27 = vmax.f32 %v246_v9, 0.0  ;;  %v831_v29 = vadd.f32 %v734_v2, %v277_v41  ;;  %v213_v9 = vpop.permute.xlu0 %212 }
 0x101   :  { %v834_v60 = vadd.f32 %v736_v3, %v329_v51  ;;  %v297_v61 = vadd.f32 %v289_v26, %v778_v7  ;;  %v306_v62 = vmax.f32 %v298_v45, 0.0  ;;  %v349_v33 = vadd.f32 %v341_v30, %v778_v7 }
 0x102   :  { %v253_v0 = vmax.f32 %v245_v59, 0.0  ;;  %v350_v63 = vadd.f32 %v342_v6, %v778_v7  ;;  %v401_v37 = vadd.f32 %v393_v31, %v778_v7  ;;  %v402_v25 = vadd.f32 %v394_v8, %v778_v7 }
 0x103   :  { %v305_v23 = vmax.f32 %v297_v61, 0.0  ;;  %v314_v38 = vadd.f32 %v306_v62, %v254_v27  ;;  %v243_v2 = vadd.f32 %v751_v18, %v778_v7  ;;  %v357_v39 = vmax.f32 %v349_v33, 0.0 }
 0x104   :  { %v358_v3 = vmax.f32 %v350_v63, 0.0  ;;  %v409_v42 = vmax.f32 %v401_v37, 0.0  ;;  %v244_v26 = vadd.f32 %v761_v36, %v778_v7  ;;  %v410_v43 = vmax.f32 %v402_v25, 0.0 }
 0x105   :  { %v313_v1 = vadd.f32 %v305_v23, %v253_v0  ;;  %v251_v30 = vmax.f32 %v243_v2, 0.0  ;;  %v295_v6 = vadd.f32 %v753_v19, %v778_v7  ;;  %v296_v8 = vadd.f32 %v769_v34, %v778_v7 }
 0x106   :  { %v366_v31 = vadd.f32 %v358_v3, %v314_v38  ;;  %v252_v10 = vmax.f32 %v244_v26, 0.0  ;;  %v347_v18 = vadd.f32 %v759_v24, %v778_v7  ;;  %v348_v36 = vadd.f32 %v776_v40, %v778_v7 }
 0x107   :  { %v365_v14 = vadd.f32 %v357_v39, %v313_v1  ;;  %v303_v44 = vmax.f32 %v295_v6, 0.0  ;;  %v391_v45 = vadd.f32 %v740_v5, %v756_v20  ;;  %v304_v49 = vmax.f32 %v296_v8, 0.0 }
 0x108   :  { %v418_v48 = vadd.f32 %v410_v43, %v366_v31  ;;  %v355_v19 = vmax.f32 %v347_v18, 0.0  ;;  %v392_v52 = vadd.f32 %v745_v11, %v772_v35  ;;  %v356_v28 = vmax.f32 %v348_v36, 0.0 }
 0x109   :  { %v417_v16 = vadd.f32 %v409_v42, %v365_v14  ;;  %v311_v34 = vadd.f32 %v303_v44, %v251_v30  ;;  %v399_v24 = vadd.f32 %v391_v45, %v778_v7  ;;  %v312_v17 = vadd.f32 %v304_v49, %v252_v10 }
 0x10a   :  { %v400_v32 = vadd.f32 %v392_v52, %v778_v7  ;;  %v247_v41 = vadd.f32 %v780_v12, %v213_v9  ;;  %v248_v40 = vadd.f32 %v240_v55, %v213_v9  ;;  %v299_v20 = vadd.f32 %v785_v13, %v213_v9 }
 0x10b   :  { %v431_v51 = vadd.f32 %v418_v48, %v417_v16  ;;  %v363_v59 = vadd.f32 %v355_v19, %v311_v34  ;;  %v407_v5 = vmax.f32 %v399_v24, 0.0  ;;  %v364_v27 = vadd.f32 %v356_v28, %v312_v17 }
 0x10c   :  { %v408_v61 = vmax.f32 %v400_v32, 0.0  ;;  %v255_v62 = vmax.f32 %v247_v41, 0.0  ;;  %v256_v11 = vmax.f32 %v248_v40, 0.0  ;;  %v300_v0 = vadd.f32 %v292_v46, %v213_v9 }
 0x10d   :  { %432 = vadd.xlane.f32.xlu0 %v431_v51  ;;  %v415_v35 = vadd.f32 %v407_v5, %v363_v59  ;;  %v307_v33 = vmax.f32 %v299_v20, 0.0  ;;  %v351_v63 = vadd.f32 %v791_v47, %v213_v9  ;;  %v352_v7 = vadd.f32 %v344_v56, %v213_v9 }
 0x10e   :  { %v416_v37 = vadd.f32 %v408_v61, %v364_v27  ;;  %v403_v12 = vadd.f32 %v796_v50, %v213_v9  ;;  %v404_v55 = vadd.f32 %v820_v57, %v213_v9  ;;  %v308_v23 = vmax.f32 %v300_v0, 0.0 }
 0x10f   :  { %v315_v38 = vadd.f32 %v307_v33, %v255_v62  ;;  %v359_v25 = vmax.f32 %v351_v63, 0.0  ;;  %v249_v13 = vadd.f32 %v799_v15, %v213_v9  ;;  %v398_v2 = vadd.f32 %v738_v4, %v827_v58 }
 0x110   :  { %v423_v39 = vadd.f32 %v416_v37, %v415_v35  ;;  %v360_v3 = vmax.f32 %v352_v7, 0.0  ;;  %v411_v46 = vmax.f32 %v403_v12, 0.0  ;;  %v316_v42 = vadd.f32 %v308_v23, %v256_v11 }
 0x111   :  { %v367_v26 = vadd.f32 %v359_v25, %v315_v38  ;;  %v250_v47 = vadd.f32 %v824_v22, %v213_v9  ;;  %v257_v56 = vmax.f32 %v249_v13, 0.0  ;;  %v301_v50 = vadd.f32 %v804_v21, %v213_v9 }
 0x112   :  { %424 = vadd.xlane.f32.xlu1 %v423_v39  ;;  %v302_v57 = vadd.f32 %v831_v29, %v213_v9  ;;  %v353_v1 = vadd.f32 %v807_v53, %v213_v9  ;;  %v354_v15 = vadd.f32 %v834_v60, %v213_v9  ;;  %v368_v43 = vadd.f32 %v360_v3, %v316_v42 }
 0x113   :  { %v412_v30 = vmax.f32 %v404_v55, 0.0  ;;  %v419_v4 = vadd.f32 %v411_v46, %v367_v26  ;;  %v258_v58 = vmax.f32 %v250_v47, 0.0  ;;  %v309_v6 = vmax.f32 %v301_v50, 0.0 }
 0x114   :  { %v310_v31 = vmax.f32 %v302_v57, 0.0  ;;  %v405_v10 = vadd.f32 %v812_v54, %v213_v9  ;;  %v406_v22 = vadd.f32 %v398_v2, %v213_v9  ;;  %v361_v44 = vmax.f32 %v353_v1, 0.0  ;;  %v442_v9 = vld [vmem:[%s882_s3 + $0x10] sm:$0xff] }
 0x115   :  { %v420_v8 = vadd.f32 %v412_v30, %v368_v43  ;;  %v317_v18 = vadd.f32 %v309_v6, %v257_v56  ;;  %v362_v21 = vmax.f32 %v354_v15, 0.0  ;;  %v608_v52 = vmov 0.0|0.0  }
 0x116   :  { %v318_v14 = vadd.f32 %v310_v31, %v258_v58  ;;  %v413_v53 = vmax.f32 %v405_v10, 0.0  ;;  %v414_v48 = vmax.f32 %v406_v22, 0.0  ;;  %562 = vmatprep.subr.bf16.mxu0 %v608_v52  ;;  %v610_v54 = vmov 0.0  }
 0x117   :  { %v426_v36 = vadd.f32 %v420_v8, %v419_v4  ;;  %v369_v29 = vadd.f32 %v361_v44, %v317_v18  ;;  %559 = vmatprep.mubr.msk.f32.mxu0 %vm609_vm2, %v610_v54  ;;  %v611_v16 = vmov 16  }
 0x118   :  { %v370_v45 = vadd.f32 %v362_v21, %v318_v14  ;;  %573 = vset.pattern.permute.xlu1 %v611_v16  ;;  %574 = vset.pattern.permute.xlu0 %v611_v16 }
 0x119   :  { %427 = vadd.xlane.f32.xlu1 %v426_v36  ;;  %v421_v60 = vadd.f32 %v413_v53, %v369_v29 }
 0x11a   :  { %v422_v49 = vadd.f32 %v414_v48, %v370_v45 }
 0x11c   :  { %v434_v19 = vadd.f32 %v422_v49, %v421_v60 }
 0x11e   :  { %435 = vadd.xlane.f32.xlu1 %v434_v19 }
 0x12f   :  { %445 = vperm.xlu1 %573, %v442_v9  }
 0x19a   :  { %v433_v24 = vpop.xlane.xlu0 %432 }
 0x19b   :  { %v437_v17 = vmul.f32 0.0009765625, %v433_v24 }
 0x19f   :  { %v425_v34 = vpop.xlane.xlu1 %424 }
 0x1a0   :  { %v429_v32 = vmul.f32 0.0009765625, %v425_v34 }
 0x1a2   :  { %v440_v59 = vsel %vm439_vm3, %v429_v32, %v437_v17 }
 0x1a6   :  { %v428_v28 = vpop.xlane.xlu1 %427 }
 0x1a7   :  { %v430_v40 = vmul.f32 0.0009765625, %v428_v28 }
 0x1ab   :  { %v436_v41 = vpop.xlane.xlu1 %435 }
 0x1ac   :  { %v438_v51 = vmul.f32 0.0009765625, %v436_v41 }
 0x1ae   :  { %v441_v5 = vsel %vm439_vm3, %v430_v40, %v438_v51 }
 0x1af   :  { %v563_v20 = vpack.c.bf16 %v441_v5, %v440_v59  ;;  %v446_v27 = vpop.permute.xlu1 %445 }
 0x1b1   :  { %564 = vmatpush3.bf16.msra.mxu0 %v563_v20 }
 0x1b4   :  { %560 = vmatmul.mubr.msk.f32.vlgmr.msra.gmra.mrb[4].mxu0 %vm448_vm4, %v442_v9 }
 0x287   :  { %v517_v61 = vpop.f32.mrb[4].mxu0 }
 0x288   :  { %v561_v62 = vpop.f32.mrb[5].mxu0  ;;  %v518_v11 = vadd.f32 %v517_v61, %v446_v27 }
 0x28a   :  { %522 = vst.msk [vmem:[%s883_s4] sm:$0xff] %vm521_vm5, %v518_v11 }
 0x28b   :  { %527 = vsyncpa [#allocation3], 1 }

</bundles_post_ra>
